<compile_context>
chip_gen: v5e
topology: v5e:2x2
jax: 0.10.0
libtpu: 0.0.40
codegen_flags: <defaults>
</compile_context>

<pallas_src>
import functools

import jax
import jax.numpy as jnp
from jax.experimental import pallas as pl
from jax.experimental.pallas import tpu as pltpu


# ----------------------------------------------------------------------------
# Small helpers
# ----------------------------------------------------------------------------
def _round_up(a, b):
    return (a + b - 1) // b * b


def _vmem_capacity_bytes():
    """Physical VMEM per TensorCore (generation-aware), with safe fallbacks."""
    try:
        cap = int(pltpu.get_tpu_info().vmem_capacity_bytes)
        if cap > 0:
            return cap
    except Exception:
        pass
    try:
        kind = jax.devices()[0].device_kind.lower()
    except Exception:
        kind = ""
    if "v7" in kind:
        return 64 << 20
    return 128 << 20  # v5e / v6e


def _chip_generation():
    try:
        kind = jax.devices()[0].device_kind.lower()
    except Exception:
        return 6
    for g in (7, 6, 5, 4, 3, 2):
        if "v%d" % g in kind:
            return g
    return 6


def _elementwise_dtype(compute_dtype):
    """dtype for bias-add / gelu: bf16 on v6e/v7x (bf16 VPU/EUP), f32 on v5e-."""
    if jnp.dtype(compute_dtype) == jnp.bfloat16 and _chip_generation() >= 6:
        return jnp.bfloat16
    return jnp.float32


def _pick_chunk(intermediate, target=512):
    """Largest multiple-of-128 divisor of I that is <= target (else I)."""
    best = None
    for c in range(128, min(intermediate, target) + 1, 128):
        if intermediate % c == 0:
            best = c
    return best if best is not None else intermediate


def _pick_streaming_ti(hidden, hidden_p, intermediate, cbytes, budget_bytes):
    """Largest multiple-of-128 divisor of I whose double-buffered W1/W2 tiles fit."""
    candidates = [c for c in range(128, intermediate + 1, 128)
                  if intermediate % c == 0]
    if not candidates:
        return intermediate  # I not a multiple of 128: keep it whole.
    for c in reversed(candidates):
        if 2 * (hidden * c + c * hidden_p) * cbytes <= budget_bytes:
            return c
    return candidates[0]


# ----------------------------------------------------------------------------
# Kernels
# ----------------------------------------------------------------------------
def _resident_mlp_kernel(x_ref, w1_ref, b1_ref, w2_ref, b2_ref, o_ref, *,
                         n_chunks, chunk, ew_dtype, approximate):
    """Weights fully resident in VMEM; chunk the intermediate dim in-kernel so
    gelu (VPU/EUP) of chunk j overlaps MXU work of neighbouring chunks."""
    x = x_ref[...].astype(w1_ref.dtype)
    # Fuse the dense_2 bias into the accumulator init (f32 accumulation).
    acc = jnp.broadcast_to(b2_ref[...].astype(jnp.float32), o_ref.shape)
    for j in range(n_chunks):  # static unrolled loop over I-chunks
        lo = j * chunk
        h = jnp.dot(x, w1_ref[:, lo:lo + chunk],
                    preferred_element_type=jnp.float32)
        h = h + b1_ref[:, lo:lo + chunk]
        h = jax.nn.gelu(h.astype(ew_dtype), approximate=approximate)
        acc = acc + jnp.dot(h.astype(w2_ref.dtype), w2_ref[lo:lo + chunk, :],
                            preferred_element_type=jnp.float32)
    # dropout: identity at inference.
    # TODO(synk): training-mode dropout (p>0) not applied; would need pltpu.prng_*.
    o_ref[...] = acc.astype(o_ref.dtype)


def _streaming_mlp_kernel(x_ref, w1_ref, b1_ref, w2_ref, b2_ref, o_ref,
                          acc_ref, *, ew_dtype, approximate):
    """Weights streamed in I-slices along a trailing reduction grid axis."""
    k = pl.program_id(1)

    @pl.when(k == 0)
    def _init():
        acc_ref[...] = jnp.broadcast_to(b2_ref[...].astype(jnp.float32),
                                        acc_ref.shape)

    x = x_ref[...].astype(w1_ref.dtype)
    h = jnp.dot(x, w1_ref[...], preferred_element_type=jnp.float32)
    h = h + b1_ref[...]
    h = jax.nn.gelu(h.astype(ew_dtype), approximate=approximate)
    acc_ref[...] += jnp.dot(h.astype(w2_ref.dtype), w2_ref[...],
                            preferred_element_type=jnp.float32)

    @pl.when(k == pl.num_programs(1) - 1)
    def _finalize():
        o_ref[...] = acc_ref[...].astype(o_ref.dtype)


# ----------------------------------------------------------------------------
# Parameter preparation (once, outside the per-call hot path)
# ----------------------------------------------------------------------------
def prepare_gpt2_mlp_params(w1, b1, w2, b2, *, compute_dtype=jnp.bfloat16):
    """Cast W1/W2 to the MXU compute dtype once, keep biases f32 (2-D), and
    pad the dense_2 output dim to a multiple of 128 when that makes the output
    lane-dense (H > 128 and H % 128 != 0, e.g. GPT-2 XL H=1600)."""
    H, I = w1.shape
    assert w2.shape == (I, H) and b1.shape[-1] == I and b2.shape[-1] == H
    Hp = _round_up(H, 128) if (H > 128 and H % 128 != 0) else H
    w1c = w1.astype(compute_dtype)
    w2c = w2.astype(compute_dtype)
    b1c = b1.reshape(1, I).astype(jnp.float32)
    b2c = b2.reshape(1, H).astype(jnp.float32)
    if Hp != H:
        w2c = jnp.pad(w2c, ((0, 0), (0, Hp - H)))
        b2c = jnp.pad(b2c, ((0, 0), (0, Hp - H)))
    return w1c, b1c, w2c, b2c


# ----------------------------------------------------------------------------
# Wrapper
# ----------------------------------------------------------------------------
def gpt2_mlp(x, w1, b1, w2, b2, *, tm=256, ti=None,
             compute_dtype=jnp.bfloat16,
             weight_vmem_budget_bytes=None,
             approximate_gelu=True,
             interpret=False):
    """GPT2MLP forward: dense_1 -> gelu -> dense_2 -> dropout(identity).

    x: [..., H].  Weights may be raw ((H,I)/(I,)/(I,H)/(H,)) or, preferably,
    the output of prepare_gpt2_mlp_params() so casts/padding are not re-done
    on every call.  Matmuls run in `compute_dtype` (bf16 default) with f32
    accumulation; biases stay f32.
    """
    *lead, H = x.shape
    M = 1
    for d in lead:
        M *= d
    out_dtype = x.dtype

    # Accept raw or prepared params; only cast/reshape when actually needed.
    if (w1.dtype != jnp.dtype(compute_dtype) or w1.ndim != 2
            or b1.ndim != 2 or b2.ndim != 2):
        w1, b1, w2, b2 = prepare_gpt2_mlp_params(
            w1, b1, w2, b2, compute_dtype=compute_dtype)
    I = w1.shape[1]
    Hp = w2.shape[1]
    assert Hp >= H and w2.shape[0] == I

    cbytes = jnp.dtype(compute_dtype).itemsize
    xbytes = jnp.dtype(x.dtype).itemsize
    obytes = jnp.dtype(out_dtype).itemsize

    # ---- Generation-aware VMEM policy ----
    vmem_capacity = _vmem_capacity_bytes()
    vmem_cap = (vmem_capacity * 3) // 4           # ~48 MiB v7x, ~96 MiB v5e/v6e
    if weight_vmem_budget_bytes is None:
        weight_vmem_budget_bytes = (
            (16 << 20) if vmem_capacity <= (64 << 20) else (56 << 20))

    # ---- Row tiling (parallel axis) ----
    tm_eff = _round_up(min(tm, _round_up(M, 8)), 8)
    # Megacore (v7x, 2 TCs): ensure the parallel row axis has >= 2 tiles.
    if M >= 16 and pl.cdiv(M, tm_eff) < 2:
        tm_eff = _round_up(pl.cdiv(M, 2), 8)
    Mp = _round_up(M, tm_eff)

    # ---- Intermediate-dim policy ----
    weight_bytes_resident = (H * I + I * Hp) * cbytes     # single-buffered
    if ti is None:
        if weight_bytes_resident <= weight_vmem_budget_bytes:
            ti = I
        else:
            ti = _pick_streaming_ti(H, Hp, I, cbytes, weight_vmem_budget_bytes)
    assert I % ti == 0, "ti must divide the intermediate size"
    nk = I // ti
    resident = (nk == 1)

    # Streaming re-fetches weights once per row tile: enlarge the row tile to
    # amortize that traffic (valuable especially on v5e's lower HBM bandwidth).
    if not resident and M > tm_eff:
        tm_eff = _round_up(min(max(tm, 512), _round_up(M, 8)), 8)
        Mp = _round_up(M, tm_eff)

    # ---- Inputs (no per-call casts; x is cast to bf16 inside the kernel) ----
    x2d = x.reshape(M, H)
    if Mp != M:
        x2d = jnp.pad(x2d, ((0, Mp - M), (0, 0)))

    ew_dtype = _elementwise_dtype(compute_dtype)

    cost = pl.CostEstimate(
        flops=2 * Mp * H * I + 2 * Mp * I * Hp,
        transcendentals=Mp * I,
        bytes_accessed=(Mp * H * xbytes + H * I * cbytes + I * Hp * cbytes
                        + (I + Hp) * 4 + Mp * Hp * obytes),
    )

    if resident:
        chunk = _pick_chunk(I)
        n_chunks = I // chunk
        kernel = functools.partial(
            _resident_mlp_kernel, n_chunks=n_chunks, chunk=chunk,
            ew_dtype=ew_dtype, approximate=approximate_gelu)

        base_footprint = (2 * tm_eff * H * xbytes          # x tiles (2 bufs)
                          + 2 * tm_eff * Hp * obytes        # out tiles (2 bufs)
                          + (I + Hp) * 4                    # biases
                          + 2 * tm_eff * chunk * 4          # h chunk temps
                          + tm_eff * Hp * 4)                # f32 accumulator

        def build(single_buffer_weights):
            w_bytes = (weight_bytes_resident if single_buffer_weights
                       else 2 * weight_bytes_resident)
            vmem_limit = int(min(max(int(1.3 * (base_footprint + w_bytes))
                                     + (4 << 20), 24 << 20), vmem_cap))
            wkw = ({"pipeline_mode": pl.Buffered(1)}
                   if single_buffer_weights else {})
            grid_spec = pltpu.PrefetchScalarGridSpec(
                num_scalar_prefetch=0,
                grid=(Mp // tm_eff,),
                in_specs=[
                    pl.BlockSpec((tm_eff, H), lambda i: (i, 0)),       # x tile
                    pl.BlockSpec((H, I), lambda i: (0, 0), **wkw),     # W1
                    pl.BlockSpec((1, I), lambda i: (0, 0), **wkw),     # b1
                    pl.BlockSpec((I, Hp), lambda i: (0, 0), **wkw),    # W2
                    pl.BlockSpec((1, Hp), lambda i: (0, 0), **wkw),    # b2
                ],
                out_specs=pl.BlockSpec((tm_eff, Hp), lambda i: (i, 0)),
            )
            return pl.pallas_call(
                kernel,
                out_shape=jax.ShapeDtypeStruct((Mp, Hp), out_dtype),
                grid_spec=grid_spec,
                compiler_params=pltpu.CompilerParams(
                    dimension_semantics=("parallel",),
                    vmem_limit_bytes=vmem_limit),
                cost_estimate=cost,
                interpret=interpret,
            )

        args = (x2d, w1, b1, w2, b2)
        try:
            # Constant-index weight blocks have nothing to prefetch: single-buffer.
            out2d = build(True)(*args)
        except (TypeError, ValueError, NotImplementedError,
                pltpu.LoweringException):
            # Narrow fallback only for builds that reject pipeline_mode=Buffered(1).
            out2d = build(False)(*args)
    else:
        kernel = functools.partial(_streaming_mlp_kernel,
                                   ew_dtype=ew_dtype,
                                   approximate=approximate_gelu)
        footprint = (2 * tm_eff * H * xbytes
                     + 2 * tm_eff * Hp * obytes
                     + 2 * (H * ti + ti * Hp) * cbytes
                     + 2 * (ti + Hp) * 4
                     + tm_eff * Hp * 4
                     + 2 * tm_eff * ti * 4)
        vmem_limit = int(min(max(int(1.3 * footprint) + (4 << 20), 24 << 20),
                             vmem_cap))
        grid_spec = pltpu.PrefetchScalarGridSpec(
            num_scalar_prefetch=0,
            grid=(Mp // tm_eff, nk),
            in_specs=[
                pl.BlockSpec((tm_eff, H), lambda i, k: (i, 0)),   # x row tile
                pl.BlockSpec((H, ti), lambda i, k: (0, k)),       # W1 I-slice
                pl.BlockSpec((1, ti), lambda i, k: (0, k)),       # b1 I-slice
                pl.BlockSpec((ti, Hp), lambda i, k: (k, 0)),      # W2 I-slice
                pl.BlockSpec((1, Hp), lambda i, k: (0, 0)),       # b2
            ],
            out_specs=pl.BlockSpec((tm_eff, Hp), lambda i, k: (i, 0)),
            scratch_shapes=[pltpu.VMEM((tm_eff, Hp), jnp.float32)],
        )
        out2d = pl.pallas_call(
            kernel,
            out_shape=jax.ShapeDtypeStruct((Mp, Hp), out_dtype),
            grid_spec=grid_spec,
            compiler_params=pltpu.CompilerParams(
                dimension_semantics=("parallel", "arbitrary"),
                vmem_limit_bytes=vmem_limit),
            cost_estimate=cost,
            interpret=interpret,
        )(x2d, w1, b1, w2, b2)

    return out2d[:M, :H].reshape(*lead, H)


# ----------------------------------------------------------------------------
# Demo / self-test
# ----------------------------------------------------------------------------
if __name__ == "__main__":
    # Small GPT2-MLP: hidden=32, intermediate=4*hidden=128, batch=2, seq=8.
    B, S, H = 2, 8, 32
    I = 4 * H
    dtype = jnp.float32

    key = jax.random.PRNGKey(0)
    kx, k1, k2, k3, k4 = jax.random.split(key, 5)

    x = jax.random.normal(kx, (B, S, H), dtype=dtype)
    # Deterministic parameter init (roughly matching nn.Linear scale).
    w1 = jax.random.normal(k1, (H, I), dtype=dtype) * (1.0 / jnp.sqrt(H))
    b1 = jax.random.normal(k2, (I,), dtype=dtype) * 0.01
    w2 = jax.random.normal(k3, (I, H), dtype=dtype) * (1.0 / jnp.sqrt(I))
    b2 = jax.random.normal(k4, (H,), dtype=dtype) * 0.01

    # Prepare (cast) the weights ONCE, outside the per-call hot path.
    params = prepare_gpt2_mlp_params(w1, b1, w2, b2,
                                     compute_dtype=jnp.bfloat16)

    out = gpt2_mlp(x, *params)
    out = jax.block_until_ready(out)

    # Precision-matched reference (bf16 matmul operands, f32 accumulation,
    # gelu in the same elementwise dtype the kernel uses on this chip).
    ew = _elementwise_dtype(jnp.bfloat16)
    xb = x.reshape(-1, H).astype(jnp.bfloat16)
    w1b = w1.astype(jnp.bfloat16)
    w2b = w2.astype(jnp.bfloat16)
    h = jnp.dot(xb, w1b, preferred_element_type=jnp.float32) + b1
    h = jax.nn.gelu(h.astype(ew), approximate=True)
    ref = jnp.dot(h.astype(jnp.bfloat16), w2b,
                  preferred_element_type=jnp.float32) + b2
    ref = ref.reshape(B, S, H).astype(dtype)

    assert out.shape == (B, S, H)
    assert jnp.allclose(out, ref, atol=2e-2, rtol=2e-2), "mismatch vs reference"

    print("KERNEL_OK")
</pallas_src>

<mosaic_0001>
module attributes {stable_mosaic.version = 11 : i64} {
  func.func @_resident_mlp_kernel(%arg0: i32, %arg1: memref<8x32xf32, #tpu.memory_space<vmem>>, %arg2: memref<32x128xbf16, #tpu.memory_space<vmem>>, %arg3: memref<1x128xf32, #tpu.memory_space<vmem>>, %arg4: memref<128x32xbf16, #tpu.memory_space<vmem>>, %arg5: memref<1x32xf32, #tpu.memory_space<vmem>>, %arg6: memref<8x32xf32, #tpu.memory_space<vmem>>) attributes {dimension_semantics = [#tpu.dimension_semantics<parallel>], iteration_bounds = array<i64: 2>, scalar_prefetch = 0 : i64, scratch_operands = 0 : i64, tpu.core_type = #tpu.core_type<tc>, window_params = [{transform_indices = @transform_0, window_bounds = array<i64: 8, 32>}, {pipeline_mode = #tpu.pipeline_mode<synchronous>, transform_indices = @transform_1, window_bounds = array<i64: 32, 128>}, {pipeline_mode = #tpu.pipeline_mode<synchronous>, transform_indices = @transform_2, window_bounds = array<i64: 1, 128>}, {pipeline_mode = #tpu.pipeline_mode<synchronous>, transform_indices = @transform_3, window_bounds = array<i64: 128, 32>}, {pipeline_mode = #tpu.pipeline_mode<synchronous>, transform_indices = @transform_4, window_bounds = array<i64: 1, 32>}, {transform_indices = @transform_5, window_bounds = array<i64: 8, 32>}]} {
    %c0 = arith.constant 0 : index
    %c0_0 = arith.constant 0 : index
    %0 = vector.load %arg1[%c0, %c0_0] : memref<8x32xf32, #tpu.memory_space<vmem>>, vector<8x32xf32>
    %1 = arith.truncf %0 : vector<8x32xf32> to vector<8x32xbf16>
    %c0_1 = arith.constant 0 : index
    %c0_2 = arith.constant 0 : index
    %2 = vector.load %arg5[%c0_1, %c0_2] : memref<1x32xf32, #tpu.memory_space<vmem>>, vector<1x32xf32>
    %3 = vector.shape_cast %2 : vector<1x32xf32> to vector<1x32xf32>
    %4 = vector.broadcast %3 : vector<1x32xf32> to vector<8x32xf32>
    %c0_3 = arith.constant 0 : index
    %c0_4 = arith.constant 0 : index
    %5 = vector.load %arg2[%c0_3, %c0_4] : memref<32x128xbf16, #tpu.memory_space<vmem>>, vector<32x128xbf16>
    %cst = arith.constant dense<0.000000e+00> : vector<8x128xf32>
    %6 = tpu.matmul %1, %5, %cst {dimension_numbers = #tpu.dot_dimension_numbers<[1], [0], [0], [1], [0, 0, 1, 1], [], []>} : vector<8x32xbf16>, vector<32x128xbf16>, vector<8x128xf32> -> vector<8x128xf32>
    %c0_5 = arith.constant 0 : index
    %c0_6 = arith.constant 0 : index
    %7 = vector.load %arg3[%c0_5, %c0_6] : memref<1x128xf32, #tpu.memory_space<vmem>>, vector<1x128xf32>
    %8 = vector.broadcast %7 : vector<1x128xf32> to vector<8x128xf32>
    %9 = arith.addf %6, %8 : vector<8x128xf32>
    %10 = arith.truncf %9 : vector<8x128xf32> to vector<8x128xbf16>
    %11 = arith.mulf %10, %10 : vector<8x128xbf16>
    %12 = arith.mulf %10, %11 : vector<8x128xbf16>
    %cst_7 = arith.constant 4.467770e-02 : bf16
    %13 = vector.broadcast %cst_7 : bf16 to vector<8x128xbf16>
    %14 = arith.mulf %13, %12 : vector<8x128xbf16>
    %15 = arith.addf %10, %14 : vector<8x128xbf16>
    %cst_8 = arith.constant 7.968750e-01 : bf16
    %16 = vector.broadcast %cst_8 : bf16 to vector<8x128xbf16>
    %17 = arith.mulf %16, %15 : vector<8x128xbf16>
    %18 = math.tanh %17 : vector<8x128xbf16>
    %cst_9 = arith.constant 1.000000e+00 : bf16
    %19 = vector.broadcast %cst_9 : bf16 to vector<8x128xbf16>
    %20 = arith.addf %19, %18 : vector<8x128xbf16>
    %cst_10 = arith.constant 5.000000e-01 : bf16
    %21 = vector.broadcast %cst_10 : bf16 to vector<8x128xbf16>
    %22 = arith.mulf %21, %20 : vector<8x128xbf16>
    %23 = arith.mulf %10, %22 : vector<8x128xbf16>
    %c0_11 = arith.constant 0 : index
    %c0_12 = arith.constant 0 : index
    %24 = vector.load %arg4[%c0_11, %c0_12] : memref<128x32xbf16, #tpu.memory_space<vmem>>, vector<128x32xbf16>
    %cst_13 = arith.constant dense<0.000000e+00> : vector<8x32xf32>
    %25 = tpu.matmul %23, %24, %cst_13 {dimension_numbers = #tpu.dot_dimension_numbers<[1], [0], [0], [1], [0, 0, 1, 1], [], []>} : vector<8x128xbf16>, vector<128x32xbf16>, vector<8x32xf32> -> vector<8x32xf32>
    %26 = arith.addf %4, %25 : vector<8x32xf32>
    %c0_14 = arith.constant 0 : index
    %c0_15 = arith.constant 0 : index
    %27 = vector.load %arg6[%c0_14, %c0_15] : memref<8x32xf32, #tpu.memory_space<vmem>>, vector<8x32xf32>
    tpu.vector_store %arg6[%c0_14, %c0_15], %26 {strides = array<i32>} : memref<8x32xf32, #tpu.memory_space<vmem>>, vector<8x32xf32>,
    return
  }
  func.func @transform_0(%arg0: i32) -> (i32, i32) {
    %c0_i32 = arith.constant 0 : i32
    %c0_i32_0 = arith.constant 0 : i32
    return %arg0, %c0_i32 : i32, i32
  }
  func.func @transform_1(%arg0: i32) -> (i32, i32) {
    %c0_i32 = arith.constant 0 : i32
    %c0_i32_0 = arith.constant 0 : i32
    %c0_i32_1 = arith.constant 0 : i32
    return %c0_i32, %c0_i32_0 : i32, i32
  }
  func.func @transform_2(%arg0: i32) -> (i32, i32) {
    %c0_i32 = arith.constant 0 : i32
    %c0_i32_0 = arith.constant 0 : i32
    %c0_i32_1 = arith.constant 0 : i32
    return %c0_i32, %c0_i32_0 : i32, i32
  }
  func.func @transform_3(%arg0: i32) -> (i32, i32) {
    %c0_i32 = arith.constant 0 : i32
    %c0_i32_0 = arith.constant 0 : i32
    %c0_i32_1 = arith.constant 0 : i32
    return %c0_i32, %c0_i32_0 : i32, i32
  }
  func.func @transform_4(%arg0: i32) -> (i32, i32) {
    %c0_i32 = arith.constant 0 : i32
    %c0_i32_0 = arith.constant 0 : i32
    %c0_i32_1 = arith.constant 0 : i32
    return %c0_i32, %c0_i32_0 : i32, i32
  }
  func.func @transform_5(%arg0: i32) -> (i32, i32) {
    %c0_i32 = arith.constant 0 : i32
    %c0_i32_0 = arith.constant 0 : i32
    return %arg0, %c0_i32 : i32, i32
  }
}

</mosaic_0001>

<bundles_post_ra>
// kernel: tpu_custom_call.1
= control target key start
LH: loop header
LB: loop body
LE: loop exit
PB: predicated region body
PF: predicated region fallthrough
CT: control target
= control target key end

     0   :  { %10 = vsyncpa [#allocation3], 0  ;;  %s767_s0 = inlined_call_operand.vmem [shape: f32[16,32], index: 0, kind: input, shape index: {}]   ;;  %s768_s1 = inlined_call_operand.vmem [shape: bf16[32,128], index: 1, kind: input, shape index: {}]   ;;  %s769_s2 = inlined_call_operand.vmem [shape: f32[1,128], index: 2, kind: input, shape index: {}]   ;;  %s770_s3 = inlined_call_operand.vmem [shape: bf16[128,32], index: 3, kind: input, shape index: {}]   ;;  %s771_s4 = inlined_call_operand.vmem [shape: f32[1,32], index: 4, kind: input, shape index: {}]   ;;  %s772_s5 = inlined_call_operand.hbm [shape: f32[16,32], index: 5, kind: output, shape index: {}]  }
   0x1   :  { %12 = vsyncpa [#allocation3 + $0x1], 0  ;;  %s644_s18 = smov 0   ;;  %s646_s19 = smov 0  }
   0x2   :  { %s648_s20 = smov 0   ;;  %s650_s21 = smov 0  }
   0x3 LB: > { %s665_s22 = sadd.s32 4294967295, %s612_s21   ;;  %s446_s23 = sadd.s32 4294967294, %s612_s21   ;;  %s612_s21 = sphi %s650_s21, %s778_s21   ;;  %s608_s20 = sphi %s648_s20, %s777_s20   ;;  %s604_s19 = sphi %s646_s19, %s776_s19   ;;  %s600_s18 = sphi %s644_s18, %s775_s18  }
   0x4   : > { %s669_s24 = sadd.s32 1, %s612_s21   ;;  %s135_s25 = sadd.s32 1, %s608_s20 }
   0x5   : > { %s132_s26 = ssub.s32 %s612_s21, %s669_s24  ;;  %p145_p0 = scmp.ne.s32.totalorder %s608_s20, %s604_s19 }
   0x6   : > { %p133_p1 = scmp.eq.s32.totalorder %s132_s26, 0  ;;  %p146_p2 = scmp.eq.s32.totalorder %s665_s22, 1 }
   0x7   : > { %p151_p3 = scmp.ne.s32.totalorder %s604_s19, %s600_s18  ;;  %p152_p4 = scmp.eq.s32.totalorder %s446_s23, 1 }
   0x8   : > { %s680_s27 = scalar_select %p133_p1, %s608_s20, %s135_s25  }
   0x9   : > { %p682_p5 = por %p146_p2, %p145_p0  ;;  %p686_p6 = por %p152_p4, %p151_p3 }
   0xa   : > { %p449_p7 = scmp.ge.s32.totalorder %s612_s21, 1  ;;  %p189_p8 = scmp.lt.s32.totalorder %s612_s21, 3 }
   0xc   : > { %p190_p9 = pnand %p449_p7, %p189_p8 }
   0xd   : > { %p216_p10 = scmp.lt.s32.totalorder (!%p190_p9), %s665_s22, 1  ;;  %s213_s16 = sand.u32 (!%p190_p9), 1, %s604_s19  }
   0xe   : > { %193 = sbr.rel (%p190_p9) target bundleno = 350 (0x15e), region = 40  ;;  %s494_s17 = sshll.u32 (!%p190_p9), %s665_s22, 3 }
   0xf   : > { %s450_s23 = sshll.u32 (!%p190_p9), %s213_s16, 3  ;;  %s382_s30 = scalar_lea.hbm (!%p190_p9), %s772_s5, %s494_s17 }
  0x10   : > { %s215_s8 = scalar_lea.vmem (!%p190_p9), [#allocation2], %s450_s23  ;;  %s570_s15 = scalar_lea.hbm (!%p190_p9), %s772_s5, 16 }
  0x13   : > { %v498_v0 = vld [vmem:[%s768_s1 + $0x8] sm:$0xff]  ;;  %v497_v1 = vld [vmem:[%s768_s1] sm:$0xff]  ;;  %s217_s9 = scalar_select %p216_p10, %s665_s22, 1  ;;  %vm247_vm0 = vcmask 261120   ;;  %v506_v5 = vld [vmem:[%s770_s3 + $0x38] sm:$0xff] }
  0x14   : > { %257 = vmatpush.bf16.msra.mxu0 %v498_v0  ;;  %v546_v4 = vld [vmem:[%s769_s2] ss:$0 sm:$0xff]  ;;  %356 = vmatpush.bf16.msra.mxu1 %v506_v5  ;;  %v505_v6 = vld [vmem:[%s770_s3 + $0x30] sm:$0xff]  ;;  %v504_v10 = vld [vmem:[%s770_s3 + $0x28] sm:$0xff]  ;;  %s372_s22 = scalar_lea.sflag [#allocation3], %s213_s16 }
  0x15   : > { %s451_s10 = sshll.u32 %s217_s9, 3  ;;  %v503_v13 = vld [vmem:[%s770_s3 + $0x20] sm:$0xff]  ;;  %v502_v17 = vld [vmem:[%s770_s3 + $0x18] sm:$0xff]  ;;  %v501_v20 = vld [vmem:[%s770_s3 + $0x10] sm:$0xff]  ;;  %s384_s9 = sshll.u32 %s215_s8, 4  ;;  %s385_s9 = int_to_ptr.vmem [resolvable:$true] %s384_s9 }
  0x16   : > { %s219_s13 = scalar_lea.vmem %s767_s0, %s451_s10  ;;  %v500_v23 = vld [vmem:[%s770_s3 + $0x8] sm:$0xff]  ;;  %v499_v26 = vld [vmem:[%s770_s3] sm:$0xff]  ;;  %s386_s10 = sshll.u32 %s382_s30, 4  ;;  %s387_s10 = int_to_ptr.hbm [resolvable:$true] %s386_s10 }
  0x17   : > { %v221_v2 = vld [vmem:[%s219_s13] sm:$0xff]  ;;  %s564_s11 = sshra.s32 %s387_s10, 4  ;;  %s565_s11 = int_to_ptr.hbm [resolvable:$true] %s564_s11 }
  0x18   : > { %258 = vmatpush.bf16.msra.mxu0 %v497_v1  ;;  %v222_v3 = vpack.c.bf16 %v221_v2, %v221_v2  ;;  %357 = vmatpush.bf16.msra.mxu1 %v505_v6  ;;  %v547_v44 = vld [vmem:[%s771_s4] ss:$0 sm:$0xff]  ;;  %s566_s12 = scalar_lea.hbm %s565_s11, 8  ;;  %p571_p0 = scmp.lt.s32.totalorder %s565_s11, %s772_s5 }
  0x19   : > { %p567_p11 = scmp.ne.s32.totalorder %s565_s11, %s566_s12  ;;  %p572_p1 = scmp.lt.s32.totalorder %s570_s15, %s566_s12 }
  0x1b   : > { %460 = vmatmul.msk.bf16.vlgmr.msra.gmra.mxu0 %vm247_vm0, %v222_v3  ;;  %p568_p12 = pnand %p567_p11, %p682_p5  ;;  %p573_p2 = por %p572_p1, %p571_p0 }
  0x1c   : > { %358 = vmatpush.bf16.msra.mxu1 %v504_v10 }
  0x1d   : > { %p569_p13 = pneg %p568_p12 }
  0x1f   : > { %p574_p3 = pnand %p573_p2, %p569_p13 }
  0x20   : > { %359 = vmatpush.bf16.msra.mxu1 %v503_v13 }
  0x24   : > { %360 = vmatpush.bf16.msra.mxu1 %v502_v17 }
  0x28   : > { %361 = vmatpush.bf16.msra.mxu1 %v501_v20 }
  0x2c   : > { %362 = vmatpush.bf16.msra.mxu1 %v500_v23 }
  0x30   : > { %363 = vmatpush.bf16.msra.mxu1 %v499_v26 }
  0x98   : > { %v260_v7 = vpop.f32.mrf.mxu0 }
  0x99   : > { %v261_v8 = vadd.f32 %v546_v4, %v260_v7 }
  0x9b   : > { %v264_v9 = vpack.c.bf16 %v261_v8, %v261_v8 }
  0x9d   : > { %v265_v11 = vunpack.c.l.bf16 %v264_v9 }
  0x9f   : > { %v266_v12 = vmul.f32 %v265_v11, %v265_v11 }
  0xa0   : > { %v262_v14 = vpop.f32.mrf.mxu0 }
  0xa1   : > { %v267_v15 = vpack.c.bf16 %v266_v12, %v266_v12 }
  0xa3   : > { %v268_v16 = vunpack.c.l.bf16 %v267_v15 }
  0xa5   : > { %v269_v18 = vmul.f32 %v268_v16, %v265_v11 }
  0xa7   : > { %v270_v19 = vpack.c.bf16 %v269_v18, %v269_v18 }
  0xa9   : > { %v271_v21 = vunpack.c.l.bf16 %v270_v19 }
  0xab   : > { %v272_v22 = vmul.f32 0.044677734, %v271_v21 }
  0xad   : > { %v273_v24 = vpack.c.bf16 %v272_v22, %v272_v22 }
  0xaf   : > { %v274_v25 = vunpack.c.l.bf16 %v273_v24 }
  0xb1   : > { %v275_v27 = vadd.f32 %v274_v25, %v265_v11 }
  0xb3   : > { %v276_v28 = vpack.c.bf16 %v275_v27, %v275_v27 }
  0xb5   : > { %v277_v29 = vunpack.c.l.bf16 %v276_v28 }
  0xb7   : > { %v278_v30 = vmul.f32 0.796875, %v277_v29 }
  0xb9   : > { %v279_v31 = vpack.c.bf16 %v278_v30, %v278_v30 }
  0xbb   : > { %v280_v32 = vunpack.c.l.bf16 %v279_v31 }
  0xbd   : > { %548 = vtanh.f32 %v280_v32 }
  0xc3   : > { %v549_v33 = vpop.eup %548 }
  0xc4   : > { %v282_v34 = vpack.c.bf16 %v549_v33, %v549_v33 }
  0xc6   : > { %v283_v35 = vunpack.c.l.bf16 %v282_v34 }
  0xc8   : > { %v284_v36 = vadd.f32 1.0, %v283_v35 }
  0xca   : > { %v285_v37 = vpack.c.bf16 %v284_v36, %v284_v36 }
  0xcc   : > { %v286_v38 = vunpack.c.l.bf16 %v285_v37 }
  0xce   : > { %v287_v39 = vmul.f32 0.5, %v286_v38 }
  0xd0   : > { %v288_v40 = vpack.c.bf16 %v287_v39, %v287_v39 }
  0xd2   : > { %v289_v41 = vunpack.c.l.bf16 %v288_v40 }
  0xd4   : > { %v290_v42 = vmul.f32 %v289_v41, %v265_v11 }
  0xd6   : > { %v291_v43 = vpack.c.bf16 %v290_v42, %v290_v42 }
  0xd8   : > { %364 = vmatmul.bf16.vlgmr.msra.gmra.mxu1 %v291_v43 }
 0x155   : > { %v365_v45 = vpop.f32.mrf.mxu1 }
 0x156   : > { %v369_v46 = vadd.f32 %v547_v44, %v365_v45 }
 0x158   : > { %370 = vst.msk [vmem:[%s215_s8] sm:$0xff] %vm247_vm0, %v369_v46 }
 0x159   : > { %577 = shalt.err (!%p574_p3)
}
 0x15a   : > { %507 = dma.vmem_to_hbm [thread:$0]  (%p682_p5), %s385_s9, 128, %s387_s10, %s372_s22  }
 0x15d   : > { %v367_v47 = vpop.f32.mrf.mxu1 }
 0x15e PF: > { %p513_p4 = scmp.ge.s32.totalorder %s612_s21, 2  ;;  %s398_s16 = sand.u32 1, %s600_s18  }
 0x15f   : > { %s399_s25 = scalar_lea.sflag [#allocation3], %s398_s16 }
 0x160   : > { %p510_p7 = pnand %p513_p4, %p686_p6 }
 0x162   : > { %p511_p8 = pneg %p510_p7 }
 0x164   : > { %595 = dma.done.wait (%p511_p8), %s399_s25, 128  }
 0x165   : > { %597 = vsyncadd (%p511_p8), %s399_s25, 4294967168  ;;  %p15_p9 = scmp.ge.s32.totalorder %s669_s24, 4   ;;  %s775_s18 = smov %s604_s19 }
 0x166   : > { %s776_s19 = smov %s608_s20  ;;  %s777_s20 = smov %s680_s27 }
 0x167   : > { %s778_s21 = smov %s669_s24  ;;  %17 = sbr.rel (!%p15_p9) target bundleno = 3 (0x3), region = 75 }
 0x16c   :  { %405 = vsyncpa [#allocation3], 1 }
 0x16d   :  { %407 = vsyncpa [#allocation3 + $0x1], 1 }

</bundles_post_ra>
